<compile_context>
chip_gen: v5e
topology: v5e:2x2
jax: 0.10.0
libtpu: 0.0.40
codegen_flags: <defaults>
</compile_context>

<pallas_src>
import functools

import jax
import jax.numpy as jnp
from jax.experimental import pallas as pl
from jax.experimental.pallas import tpu as pltpu


TM = 512  # batch tile for the gridded path (sweep 256-1024; 512 ~ HBM roofline knee)


# ----------------------------------------------------------------------------
# Fused kernel: chains a static op-list (linear / relu / tanh).
#   refs = (x_ref, w0_ref, b0_ref, w1_ref, b1_ref, ..., o_ref)
# Everything lives in VMEM; intermediates stay in vregs (or spill to VMEM at
# large TM, which is still far cheaper than extra grid steps).
# ----------------------------------------------------------------------------
def _fused_seq_kernel(*refs, ops):
    x_ref = refs[0]
    o_ref = refs[-1]
    wb = refs[1:-1]

    h = x_ref[...].astype(jnp.float32)
    li = 0
    for op in ops:
        if op == "linear":
            w = wb[2 * li][...]
            b = wb[2 * li + 1][...]
            h = jnp.dot(h, w, preferred_element_type=jnp.float32) + b
            li += 1
        elif op == "relu":
            h = jnp.maximum(h, 0.0)
        elif op == "tanh":
            h = jnp.tanh(h)
        else:
            raise ValueError(f"unknown op {op}")
    o_ref[...] = h.astype(o_ref.dtype)


def fused_mlp_forward(x, params, ops, d_out):
    """Run the whole Linear/act chain as one pallas_call.

    params: list of (w, b) with shapes (Din, Dout), (1, Dout) — unpadded.
    ops:    static tuple like ("linear","relu","linear","relu","linear","tanh")
    d_out:  output feature count of the last Linear.
    """
    batch, d_in = x.shape
    flat_wb = [a for wb in params for a in wb]
    kernel = functools.partial(_fused_seq_kernel, ops=tuple(ops))
    n_in = 1 + len(flat_wb)
    out_shape = jax.ShapeDtypeStruct((batch, d_out), x.dtype)

    if batch <= TM:
        # Small batch: single fused invocation, no grid, no wrapper pad/slice.
        # TODO(synk): at batch ~ 8 the fixed pallas_call launch dominates; a
        # plain XLA fusion would be equally fast, but we keep the Pallas path.
        return pl.pallas_call(
            kernel,
            out_shape=out_shape,
            in_specs=[pl.BlockSpec(memory_space=pltpu.MemorySpace.VMEM)] * n_in,
            out_specs=pl.BlockSpec(memory_space=pltpu.MemorySpace.VMEM),
        )(x, *flat_wb)

    # Large batch: grid over batch tiles (ragged last tile handled by Pallas —
    # OOB output rows are dropped and the matmul is row-wise, so undefined
    # rows in the last input tile never reach real output rows).
    # Weight/bias index_maps are constant -> resident in VMEM across tiles.
    # Batch axis is "parallel" (shards across both TensorCores on v7x).
    wb_specs = []
    for w, b in params:
        wb_specs.append(pl.BlockSpec(w.shape, lambda i: (0, 0)))
        wb_specs.append(pl.BlockSpec(b.shape, lambda i: (0, 0)))
    grid = (pl.cdiv(batch, TM),)
    return pl.pallas_call(
        kernel,
        out_shape=out_shape,
        grid=grid,
        in_specs=[pl.BlockSpec((TM, d_in), lambda i: (i, 0))] + wb_specs,
        out_specs=pl.BlockSpec((TM, d_out), lambda i: (i, 0)),
        compiler_params=pltpu.CompilerParams(
            dimension_semantics=("parallel",)),
    )(x, *flat_wb)


# ----------------------------------------------------------------------------
# Standalone element-wise activation kernel (VPU/EUP only), row-gridded so big
# inputs never need to fit entirely in VMEM and get the standard pipeline.
# ----------------------------------------------------------------------------
def _eltwise_kernel(x_ref, o_ref, *, activation):
    h = x_ref[...]
    if activation == "relu":
        h = jnp.maximum(h, 0.0)
    else:  # tanh
        h = jnp.tanh(h)
    o_ref[...] = h.astype(o_ref.dtype)


def eltwise_act(x, activation):
    rows, cols = x.shape
    block_rows = min(TM, rows)  # == rows (full dim) when small, else 512 (8-divisible)
    grid = (pl.cdiv(rows, block_rows),)
    return pl.pallas_call(
        functools.partial(_eltwise_kernel, activation=activation),
        out_shape=jax.ShapeDtypeStruct(x.shape, x.dtype),
        grid=grid,
        in_specs=[pl.BlockSpec((block_rows, cols), lambda i: (i, 0))],
        out_specs=pl.BlockSpec((block_rows, cols), lambda i: (i, 0)),
        compiler_params=pltpu.CompilerParams(
            dimension_semantics=("parallel",)),
    )(x)


# ----------------------------------------------------------------------------
# Module mini-framework mirroring project_2/neural_network.py (forward only)
# ----------------------------------------------------------------------------
class Module:
    def forward(self, x):
        raise NotImplementedError

    def param(self):
        return []


class Linear(Module):
    def __init__(self, key, d_in, d_out, dtype=jnp.float32):
        kw, kb = jax.random.split(key)
        scale = 1.0 / jnp.sqrt(jnp.asarray(d_in, dtype))
        self.d_in, self.d_out = d_in, d_out
        self.w = jax.random.normal(kw, (d_in, d_out), dtype) * scale
        self.b = jax.random.normal(kb, (1, d_out), dtype) * scale

    def forward(self, x):
        return fused_mlp_forward(x, [(self.w, self.b)], ("linear",), self.d_out)

    def param(self):
        return [self.w, self.b]


class ReLU(Module):
    def forward(self, x):
        return eltwise_act(x, "relu")


class Tanh(Module):
    def forward(self, x):
        return eltwise_act(x, "tanh")


class Sequential(Module):
    """Faithful port of the PyTorch Sequential container (forward pass)."""

    def __init__(self, *modules):
        self.modules = modules

    def forward(self, x):
        # Fast path: the whole Linear/ReLU/Tanh chain runs as ONE fused
        # pallas_call (same math as chaining the sub-module forwards).
        fused = self._try_fused_forward(x)
        if fused is not None:
            return fused
        # Fallback: literal chaining, exactly like the PyTorch forward loop.
        for module in self.modules:
            x = module.forward(x)
        x_out = x
        return x_out

    def _try_fused_forward(self, x):
        ops, params, d_out = [], [], None
        for m in self.modules:
            if isinstance(m, Linear):
                ops.append("linear")
                params.append((m.w, m.b))
                d_out = m.d_out
            elif isinstance(m, ReLU):
                ops.append("relu")
            elif isinstance(m, Tanh):
                ops.append("tanh")
            else:
                return None  # unknown module -> fall back to per-module chain
        if not params:
            return None
        return fused_mlp_forward(x, params, tuple(ops), d_out)

    # TODO(synk): backward() (reverse-mode chaining) not implemented — only the
    # forward pass is required; use jax.grad on a functional wrapper instead.

    def param(self):
        all_parameters = []
        for module in self.modules:
            all_parameters.extend(module.param())
        return all_parameters


# ----------------------------------------------------------------------------
# Plain-JAX reference for correctness check
# ----------------------------------------------------------------------------
def reference_forward(x, params):
    (w1, b1), (w2, b2), (w3, b3) = params
    h = jnp.maximum(x @ w1 + b1, 0.0)
    h = jnp.maximum(h @ w2 + b2, 0.0)
    return jnp.tanh(h @ w3 + b3)


if __name__ == "__main__":
    key = jax.random.PRNGKey(0)
    k_in, k1, k2, k3, k_big = jax.random.split(key, 5)

    batch, d_in, d_hidden, d_out = 8, 32, 64, 32
    x = jax.random.normal(k_in, (batch, d_in), jnp.float32)

    lin1 = Linear(k1, d_in, d_hidden)
    lin2 = Linear(k2, d_hidden, d_hidden)
    lin3 = Linear(k3, d_hidden, d_out)
    model = Sequential(lin1, ReLU(), lin2, ReLU(), lin3, Tanh())
    params = [(lin1.w, lin1.b), (lin2.w, lin2.b), (lin3.w, lin3.b)]

    # 1) Small batch: single fused kernel, no grid, no pad/slice wrapper ops.
    out = jax.block_until_ready(model.forward(x))
    ref = reference_forward(x, params)
    assert out.shape == (batch, d_out), out.shape
    assert jnp.allclose(out, ref, atol=1e-5, rtol=1e-5), float(
        jnp.max(jnp.abs(out - ref)))

    # 2) Larger batch: gridded path (TM=512, >=2 tiles, ragged last tile).
    xb = jax.random.normal(k_big, (1100, d_in), jnp.float32)
    outb = jax.block_until_ready(model.forward(xb))
    refb = reference_forward(xb, params)
    assert outb.shape == (1100, d_out), outb.shape
    assert jnp.allclose(outb, refb, atol=1e-5, rtol=1e-5), float(
        jnp.max(jnp.abs(outb - refb)))

    # 3) Standalone element-wise activation modules (fallback path sanity).
    r = jax.block_until_ready(ReLU().forward(x))
    assert jnp.allclose(r, jnp.maximum(x, 0.0), atol=1e-6)
    t = jax.block_until_ready(Tanh().forward(xb))
    assert jnp.allclose(t, jnp.tanh(xb), atol=1e-6)

    print("KERNEL_OK")
</pallas_src>

<mosaic_0001>
module attributes {stable_mosaic.version = 11 : i64} {
  func.func @_fused_seq_kernel(%arg0: memref<8x32xf32, #tpu.memory_space<vmem>>, %arg1: memref<32x64xf32, #tpu.memory_space<vmem>>, %arg2: memref<1x64xf32, #tpu.memory_space<vmem>>, %arg3: memref<64x64xf32, #tpu.memory_space<vmem>>, %arg4: memref<1x64xf32, #tpu.memory_space<vmem>>, %arg5: memref<64x32xf32, #tpu.memory_space<vmem>>, %arg6: memref<1x32xf32, #tpu.memory_space<vmem>>, %arg7: memref<8x32xf32, #tpu.memory_space<vmem>>) attributes {dimension_semantics = [], scalar_prefetch = 0 : i64, scratch_operands = 0 : i64, tpu.core_type = #tpu.core_type<tc>} {
    %c0 = arith.constant 0 : index
    %c0_0 = arith.constant 0 : index
    %0 = vector.load %arg0[%c0, %c0_0] : memref<8x32xf32, #tpu.memory_space<vmem>>, vector<8x32xf32>
    %c0_1 = arith.constant 0 : index
    %c0_2 = arith.constant 0 : index
    %1 = vector.load %arg1[%c0_1, %c0_2] : memref<32x64xf32, #tpu.memory_space<vmem>>, vector<32x64xf32>
    %c0_3 = arith.constant 0 : index
    %c0_4 = arith.constant 0 : index
    %2 = vector.load %arg2[%c0_3, %c0_4] : memref<1x64xf32, #tpu.memory_space<vmem>>, vector<1x64xf32>
    %cst = arith.constant dense<0.000000e+00> : vector<8x64xf32>
    %3 = tpu.matmul %0, %1, %cst {dimension_numbers = #tpu.dot_dimension_numbers<[1], [0], [0], [1], [0, 0, 1, 1], [], []>} : vector<8x32xf32>, vector<32x64xf32>, vector<8x64xf32> -> vector<8x64xf32>
    %4 = vector.broadcast %2 : vector<1x64xf32> to vector<8x64xf32>
    %5 = arith.addf %3, %4 : vector<8x64xf32>
    %cst_5 = arith.constant 0.000000e+00 : f32
    %6 = vector.broadcast %cst_5 : f32 to vector<8x64xf32>
    %7 = arith.maximumf %5, %6 : vector<8x64xf32>
    %c0_6 = arith.constant 0 : index
    %c0_7 = arith.constant 0 : index
    %8 = vector.load %arg3[%c0_6, %c0_7] : memref<64x64xf32, #tpu.memory_space<vmem>>, vector<64x64xf32>
    %c0_8 = arith.constant 0 : index
    %c0_9 = arith.constant 0 : index
    %9 = vector.load %arg4[%c0_8, %c0_9] : memref<1x64xf32, #tpu.memory_space<vmem>>, vector<1x64xf32>
    %cst_10 = arith.constant dense<0.000000e+00> : vector<8x64xf32>
    %10 = tpu.matmul %7, %8, %cst_10 {dimension_numbers = #tpu.dot_dimension_numbers<[1], [0], [0], [1], [0, 0, 1, 1], [], []>} : vector<8x64xf32>, vector<64x64xf32>, vector<8x64xf32> -> vector<8x64xf32>
    %11 = vector.broadcast %9 : vector<1x64xf32> to vector<8x64xf32>
    %12 = arith.addf %10, %11 : vector<8x64xf32>
    %cst_11 = arith.constant 0.000000e+00 : f32
    %13 = vector.broadcast %cst_11 : f32 to vector<8x64xf32>
    %14 = arith.maximumf %12, %13 : vector<8x64xf32>
    %c0_12 = arith.constant 0 : index
    %c0_13 = arith.constant 0 : index
    %15 = vector.load %arg5[%c0_12, %c0_13] : memref<64x32xf32, #tpu.memory_space<vmem>>, vector<64x32xf32>
    %c0_14 = arith.constant 0 : index
    %c0_15 = arith.constant 0 : index
    %16 = vector.load %arg6[%c0_14, %c0_15] : memref<1x32xf32, #tpu.memory_space<vmem>>, vector<1x32xf32>
    %cst_16 = arith.constant dense<0.000000e+00> : vector<8x32xf32>
    %17 = tpu.matmul %14, %15, %cst_16 {dimension_numbers = #tpu.dot_dimension_numbers<[1], [0], [0], [1], [0, 0, 1, 1], [], []>} : vector<8x64xf32>, vector<64x32xf32>, vector<8x32xf32> -> vector<8x32xf32>
    %18 = vector.broadcast %16 : vector<1x32xf32> to vector<8x32xf32>
    %19 = arith.addf %17, %18 : vector<8x32xf32>
    %20 = math.tanh %19 : vector<8x32xf32>
    %c0_17 = arith.constant 0 : index
    %c0_18 = arith.constant 0 : index
    %21 = vector.load %arg7[%c0_17, %c0_18] : memref<8x32xf32, #tpu.memory_space<vmem>>, vector<8x32xf32>
    tpu.vector_store %arg7[%c0_17, %c0_18], %20 {strides = array<i32>} : memref<8x32xf32, #tpu.memory_space<vmem>>, vector<8x32xf32>,
    return
  }
}

</mosaic_0001>

<bundles_post_ra>
// kernel: tpu_custom_call.1
= control target key start
LH: loop header
LB: loop body
LE: loop exit
PB: predicated region body
PF: predicated region fallthrough
CT: control target
= control target key end

     0   :  { %12 = vsyncpa [#allocation3], 0  ;;  %s347_s0 = inlined_call_operand.hbm [shape: f32[8,32], index: 0, kind: input, shape index: {}]   ;;  %s348_s1 = inlined_call_operand.vmem [shape: f32[32,64], index: 1, kind: input, shape index: {}]   ;;  %s349_s2 = inlined_call_operand.vmem [shape: f32[1,64], index: 2, kind: input, shape index: {}]   ;;  %s350_s3 = inlined_call_operand.vmem [shape: f32[64,64], index: 3, kind: input, shape index: {}]   ;;  %s351_s4 = inlined_call_operand.vmem [shape: f32[1,64], index: 4, kind: input, shape index: {}]   ;;  %s352_s5 = inlined_call_operand.vmem [shape: f32[64,32], index: 5, kind: input, shape index: {}]   ;;  %s353_s6 = inlined_call_operand.vmem [shape: f32[1,32], index: 6, kind: input, shape index: {}]   ;;  %s354_s7 = inlined_call_operand.hbm [shape: f32[8,32], index: 7, kind: output, shape index: {}]  }
   0x1   :  { %13 = vsyncpa [#allocation4], 0  ;;  %s19_s26 = sshll.u32 %s347_s0, 4  ;;  %s228_s27 = smov [#allocation2]   ;;  %s20_s26 = int_to_ptr.hbm [resolvable:$true] %s19_s26 }
   0x2   :  { %s21_s28 = sshll.u32 %s228_s27, 4  ;;  %s22_s28 = int_to_ptr.vmem [resolvable:$true] %s21_s28 }
   0x3   :  { %24 = dma.hbm_to_vmem [thread:$0]  %s20_s26, 128, %s22_s28, [#allocation3]  }
   0x4   :  { %224 = dma.done.wait [#allocation3], 128  }
   0x5   :  { %225 = vsyncadd [#allocation3], 4294967168  ;;  %v45_v0 = vld [vmem:[%s348_s1 + $0x18] sm:$0xff]  ;;  %v44_v1 = vld [vmem:[%s348_s1 + $0x10] sm:$0xff]  ;;  %vm50_vm0 = vcmask 261120   ;;  %vm87_vm1 = vcmask 523264  }
   0x6   :  { %66 = vmatpush.msra.mxu0 %v45_v0  ;;  %v82_v2 = vld [vmem:[%s350_s3 + $0x38] sm:$0xff]  ;;  %v43_v3 = vld [vmem:[%s348_s1 + $0x8] sm:$0xff]  ;;  %v81_v4 = vld [vmem:[%s350_s3 + $0x30] sm:$0xff]  ;;  %s156_s26 = sshll.u32 %s354_s7, 4  ;;  %s157_s26 = int_to_ptr.hbm [resolvable:$true] %s156_s26 }
   0x7   :  { %99 = vmatpush.msra.mxu1 %v82_v2  ;;  %v80_v5 = vld [vmem:[%s350_s3 + $0x28] sm:$0xff]  ;;  %v42_v6 = vld [vmem:[%s348_s1] sm:$0xff]  ;;  %v78_v9 = vld [vmem:[%s350_s3 + $0x18] sm:$0xff]  ;;  %s229_s1 = smov [#allocation5]  }
   0x8   :  { %67 = vmatpush.msra.mxu0 %v44_v1  ;;  %v41_v7 = vld [vmem:[#allocation2] sm:$0xff]  ;;  %v77_v10 = vld [vmem:[%s350_s3 + $0x10] sm:$0xff]  ;;  %v76_v11 = vld [vmem:[%s350_s3 + $0x8] sm:$0xff]  ;;  %s154_s24 = sshll.u32 %s229_s1, 4  ;;  %s155_s24 = int_to_ptr.vmem [resolvable:$true] %s154_s24 }
   0x9   :  { %100 = vmatpush.msra.mxu1 %v81_v4  ;;  %v79_v8 = vld [vmem:[%s350_s3 + $0x20] sm:$0xff]  ;;  %v119_v13 = vld [vmem:[%s352_s5 + $0x38] sm:$0xff]  ;;  %v118_v14 = vld [vmem:[%s352_s5 + $0x30] sm:$0xff] }
   0xa   :  { %68 = vmatpush.msra.mxu0 %v43_v3  ;;  %v75_v12 = vld [vmem:[%s350_s3] sm:$0xff]  ;;  %135 = vmatpush.msra.mxu2 %v119_v13  ;;  %v117_v15 = vld [vmem:[%s352_s5 + $0x28] sm:$0xff]  ;;  %v115_v17 = vld [vmem:[%s352_s5 + $0x18] sm:$0xff] }
   0xb   :  { %101 = vmatpush.msra.mxu1 %v80_v5  ;;  %v116_v16 = vld [vmem:[%s352_s5 + $0x20] sm:$0xff]  ;;  %v114_v22 = vld [vmem:[%s352_s5 + $0x10] sm:$0xff]  ;;  %v113_v23 = vld [vmem:[%s352_s5 + $0x8] sm:$0xff] }
   0xc   :  { %69 = vmatpush.msra.mxu0 %v42_v6  ;;  %136 = vmatpush.msra.mxu2 %v118_v14  ;;  %v171_v18 = vld [vmem:[%s349_s2] ss:$0 sm:$0xff] }
   0xd   :  { %166 = vmatmul.msk.f32.vlgmr.msra.gmra.mxu0 %vm50_vm0, %v41_v7  ;;  %102 = vmatpush.msra.mxu1 %v79_v8  ;;  %v112_v24 = vld [vmem:[%s352_s5] sm:$0xff] }
   0xe   :  { %137 = vmatpush.msra.mxu2 %v117_v15  ;;  %v172_v25 = vld [vmem:[%s351_s4] ss:$0 sm:$0xff] }
   0xf   :  { %103 = vmatpush.msra.mxu1 %v78_v9  ;;  %v173_v29 = vld [vmem:[%s353_s6] ss:$0 sm:$0xff] }
  0x10   :  { %138 = vmatpush.msra.mxu2 %v116_v16 }
  0x11   :  { %104 = vmatpush.msra.mxu1 %v77_v10 }
  0x12   :  { %139 = vmatpush.msra.mxu2 %v115_v17 }
  0x13   :  { %105 = vmatpush.msra.mxu1 %v76_v11 }
  0x14   :  { %140 = vmatpush.msra.mxu2 %v114_v22 }
  0x15   :  { %106 = vmatpush.msra.mxu1 %v75_v12 }
  0x16   :  { %141 = vmatpush.msra.mxu2 %v113_v23 }
  0x18   :  { %142 = vmatpush.msra.mxu2 %v112_v24 }
  0x8a   :  { %v71_v19 = vpop.f32.mrf.mxu0 }
  0x8b   :  { %v72_v20 = vadd.f32 %v171_v18, %v71_v19 }
  0x8d   :  { %v74_v21 = vmax.f32 %v72_v20, 0.0 }
  0x8f   :  { %167 = vmatmul.msk.f32.vlgmr.msra.gmra.mxu1 %vm87_vm1, %v74_v21 }
 0x10c   :  { %v108_v26 = vpop.f32.mrf.mxu1 }
 0x10d   :  { %v109_v27 = vadd.f32 %v172_v25, %v108_v26 }
 0x10f   :  { %v111_v28 = vmax.f32 %v109_v27, 0.0 }
 0x111   :  { %168 = vmatmul.msk.f32.vlgmr.msra.gmra.mxu2 %vm87_vm1, %v111_v28 }
 0x194   :  { %v144_v30 = vpop.f32.mrf.mxu2 }
 0x195   :  { %v145_v31 = vadd.f32 %v173_v29, %v144_v30 }
 0x197   :  { %174 = vtanh.f32 %v145_v31 }
 0x19d   :  { %v175_v32 = vpop.eup %174 }
 0x19e   :  { %148 = vst.msk [vmem:[#allocation5] sm:$0xff] %vm50_vm0, %v175_v32 }
 0x19f   :  { %159 = dma.vmem_to_hbm [thread:$0]  %s155_s24, 128, %s157_s26, [#allocation4]  }
 0x1a0   :  { %226 = dma.done.wait [#allocation4], 128  }
 0x1a1   :  { %227 = vsyncadd [#allocation4], 4294967168 }
 0x1a2   :  { %164 = vsyncpa [#allocation3], 1 }
 0x1a3   :  { %165 = vsyncpa [#allocation4], 1 }

</bundles_post_ra>
